<compile_context>
chip_gen: v5e
topology: v5e:2x2
jax: 0.10.0
libtpu: 0.0.40
codegen_flags: <defaults>
</compile_context>

<pallas_src>
import jax
import jax.numpy as jnp
from jax.experimental import pallas as pl
from jax.experimental.pallas import tpu as pltpu


def _add3_kernel(a_ref, b_ref, c_ref, o_ref):
    # x798 = x797 + x783 ; x813 = x812 + x798
    o_ref[...] = c_ref[...] + (a_ref[...] + b_ref[...])


def _lane_dense_2d(n):
    """For n a multiple of 128: pick (rows, cols) with rows*cols == n and cols
    the largest multiple of 128 that keeps rows >= 8 (when achievable)."""
    assert n % 128 == 0
    best_cols = 128
    d_max = n // 128
    for d in range(1, d_max + 1):
        if d_max % d == 0:
            cols = 128 * d
            rows = n // cols
            if rows >= 8 and cols > best_cols:
                best_cols = cols
    return n // best_cols, best_cols


# Per-operand single-block cap before we switch to a row-tiled grid.  With
# 4 buffers (3 in + 1 out) and double-buffering this stays far below the
# 16/32 MiB scoped VMEM defaults on v5e/v6e/v7x.
_MAX_SINGLE_BLOCK_BYTES = 4 * 1024 * 1024


def add3(x797, x783, x812):
    assert x797.shape == x783.shape == x812.shape
    assert x797.dtype == x783.dtype == x812.dtype
    orig_shape = x797.shape
    dtype = x797.dtype
    itemsize = jnp.dtype(dtype).itemsize

    n = 1
    for d in orig_shape:
        n *= d

    # ---- lane-dense 2D layout (pad flat tail to a 128-lane boundary if needed)
    if n % 128 == 0:
        rows, cols = _lane_dense_2d(n)
        n_pad = n
    else:
        # Not hit for this module (31360 % 128 == 0); generic fallback keeps
        # stores unmasked by padding, instead of a lane-sparse (1, n) block.
        cols = 128
        rows = -(-n // cols)
        n_pad = rows * cols

    def to2d(x):
        flat = x.reshape(-1)
        if n_pad != n:
            flat = jnp.pad(flat, (0, n_pad - n))
        return flat.reshape(rows, cols)

    a2, b2, c2 = to2d(x797), to2d(x783), to2d(x812)

    cost = pl.CostEstimate(flops=2 * n, transcendentals=0,
                           bytes_accessed=4 * n * itemsize)

    block_bytes = rows * cols * itemsize
    if block_bytes <= _MAX_SINGLE_BLOCK_BYTES:
        # Single grid-less full-array block: no grid-step / pipeline overhead,
        # block == full dims so the (8,128) divisibility rule is waived.
        spec = pl.BlockSpec((rows, cols), lambda: (0, 0))
        out2 = pl.pallas_call(
            _add3_kernel,
            out_shape=jax.ShapeDtypeStruct((rows, cols), dtype),
            in_specs=[spec, spec, spec],
            out_specs=spec,
            input_output_aliases={2: 0},   # write result into x812's buffer
            cost_estimate=cost,
        )(a2, b2, c2)
    else:
        # Large-n path: row-tiled grid, still lane-dense 128-multiple stores.
        tile_rows = max(8, (_MAX_SINGLE_BLOCK_BYTES // (cols * itemsize)) // 8 * 8)
        grid = (-(-rows // tile_rows),)
        spec = pl.BlockSpec((tile_rows, cols), lambda i: (i, 0))
        out2 = pl.pallas_call(
            _add3_kernel,
            out_shape=jax.ShapeDtypeStruct((rows, cols), dtype),
            grid=grid,
            in_specs=[spec, spec, spec],
            out_specs=spec,
            input_output_aliases={2: 0},
            cost_estimate=cost,
            compiler_params=pltpu.CompilerParams(
                dimension_semantics=("parallel",)),
        )(a2, b2, c2)

    if n_pad != n:
        out2 = out2.reshape(-1)[:n]
    return out2.reshape(orig_shape)


if __name__ == "__main__":
    key = jax.random.PRNGKey(0)
    k1, k2, k3 = jax.random.split(key, 3)
    shape = (1, 640, 7, 7)  # matches the PyTorch module's tensors
    x783 = jax.random.normal(k1, shape, dtype=jnp.float32)
    x797 = jax.random.normal(k2, shape, dtype=jnp.float32)
    x812 = jax.random.normal(k3, shape, dtype=jnp.float32)

    # Compute the reference BEFORE the kernel call: x812's reshaped buffer is
    # aliased/donated to the kernel output.
    ref = x812 + (x797 + x783)

    out = add3(x797, x783, x812)
    jax.block_until_ready(out)

    assert out.shape == shape and out.dtype == jnp.float32
    assert jnp.allclose(out, ref, atol=1e-6, rtol=1e-6)
    print("KERNEL_OK")
</pallas_src>

<mosaic_0001>
module attributes {stable_mosaic.version = 11 : i64} {
  func.func @_add3_kernel(%arg0: memref<35x896xf32, #tpu.memory_space<vmem>>, %arg1: memref<35x896xf32, #tpu.memory_space<vmem>>, %arg2: memref<35x896xf32, #tpu.memory_space<vmem>>, %arg3: memref<35x896xf32, #tpu.memory_space<vmem>>) attributes {dimension_semantics = [], scalar_prefetch = 0 : i64, scratch_operands = 0 : i64, tpu.core_type = #tpu.core_type<tc>} {
    %c0 = arith.constant 0 : index
    %c0_0 = arith.constant 0 : index
    %0 = vector.load %arg2[%c0, %c0_0] : memref<35x896xf32, #tpu.memory_space<vmem>>, vector<35x896xf32>
    %c0_1 = arith.constant 0 : index
    %c0_2 = arith.constant 0 : index
    %1 = vector.load %arg0[%c0_1, %c0_2] : memref<35x896xf32, #tpu.memory_space<vmem>>, vector<35x896xf32>
    %c0_3 = arith.constant 0 : index
    %c0_4 = arith.constant 0 : index
    %2 = vector.load %arg1[%c0_3, %c0_4] : memref<35x896xf32, #tpu.memory_space<vmem>>, vector<35x896xf32>
    %3 = arith.addf %1, %2 : vector<35x896xf32>
    %4 = arith.addf %0, %3 : vector<35x896xf32>
    %c0_5 = arith.constant 0 : index
    %c0_6 = arith.constant 0 : index
    %5 = vector.load %arg3[%c0_5, %c0_6] : memref<35x896xf32, #tpu.memory_space<vmem>>, vector<35x896xf32>
    tpu.vector_store %arg3[%c0_5, %c0_6], %4 {strides = array<i32>} : memref<35x896xf32, #tpu.memory_space<vmem>>, vector<35x896xf32>,
    return
  }
}

</mosaic_0001>

<bundles_post_ra>
// kernel: tpu_custom_call.1
= control target key start
LH: loop header
LB: loop body
LE: loop exit
PB: predicated region body
PF: predicated region fallthrough
CT: control target
= control target key end

     0   :  { %8 = vsyncpa [#allocation3], 0  ;;  %s562_s0 = inlined_call_operand.vmem [shape: f32[35,896], index: 0, kind: input, shape index: {}]   ;;  %s563_s1 = inlined_call_operand.vmem [shape: f32[35,896], index: 1, kind: input, shape index: {}]   ;;  %s564_s2 = inlined_call_operand.hbm [shape: f32[35,896], index: 2, kind: input, shape index: {}, may-alias: {2,3}]   ;;  %s565_s3 = inlined_call_operand.hbm [shape: f32[35,896], index: 3, kind: output, shape index: {}, may-alias: {2,3}]  }
   0x1   :  { %9 = vsyncpa [#allocation4], 0  ;;  %s18_s14 = sshll.u32 %s564_s2, 4  ;;  %s316_s15 = smov [#allocation2]   ;;  %s19_s14 = int_to_ptr.hbm [resolvable:$true] %s18_s14 }
   0x2   :  { %s20_s16 = sshll.u32 %s316_s15, 4  ;;  %s317_s17 = smov 896   ;;  %s21_s16 = int_to_ptr.vmem [resolvable:$true] %s20_s16 }
   0x3   :  { %s318_s18 = smov 56  }
   0x4   :  { %26 = dma.hbm_to_vmem [thread:$0]  %s19_s14, 4480, %s21_s16, [#allocation3], %s317_s17, %s317_s17, %s318_s18  }
   0x5   :  { %312 = dma.done.wait [#allocation3], 4480  }
   0x6   :  { %313 = vsyncadd [#allocation3], 4294962816  ;;  %v31_v0 = vld [vmem:[#allocation2] sm:$0xff]  ;;  %v32_v4 = vld [vmem:[#allocation2 + $0x8] sm:$0xff]  ;;  %s319_s2 = smov [#allocation5]   ;;  %s247_s26 = sshll.u32 %s565_s3, 4  ;;  %s248_s26 = int_to_ptr.hbm [resolvable:$true] %s247_s26 }
   0x7   :  { %v66_v1 = vld [vmem:[%s562_s0] sm:$0xff]  ;;  %v67_v5 = vld [vmem:[%s562_s0 + $0x8] sm:$0xff]  ;;  %v33_v8 = vld [vmem:[#allocation2 + $0x10] sm:$0xff]  ;;  %s245_s23 = sshll.u32 %s319_s2, 4  ;;  %s246_s23 = int_to_ptr.vmem [resolvable:$true] %s245_s23 }
   0x8   :  { %v101_v2 = vld [vmem:[%s563_s1] sm:$0xff]  ;;  %v102_v6 = vld [vmem:[%s563_s1 + $0x8] sm:$0xff]  ;;  %v68_v9 = vld [vmem:[%s562_s0 + $0x10] sm:$0xff] }
   0x9   :  { %v136_v3 = vadd.f32 %v101_v2, %v66_v1  ;;  %v137_v7 = vadd.f32 %v102_v6, %v67_v5  ;;  %v103_v10 = vld [vmem:[%s563_s1 + $0x10] sm:$0xff]  ;;  %v34_v13 = vld [vmem:[#allocation2 + $0x18] sm:$0xff]  ;;  %v35_v18 = vld [vmem:[#allocation2 + $0x20] sm:$0xff] }
   0xa   :  { %v138_v12 = vadd.f32 %v103_v10, %v68_v9  ;;  %v69_v14 = vld [vmem:[%s562_s0 + $0x18] sm:$0xff]  ;;  %v70_v19 = vld [vmem:[%s562_s0 + $0x20] sm:$0xff]  ;;  %v36_v23 = vld [vmem:[#allocation2 + $0x28] sm:$0xff] }
   0xb   :  { %v171_v11 = vadd.f32 %v136_v3, %v31_v0  ;;  %v104_v15 = vld [vmem:[%s563_s1 + $0x18] sm:$0xff]  ;;  %v172_v16 = vadd.f32 %v137_v7, %v32_v4  ;;  %v105_v20 = vld [vmem:[%s563_s1 + $0x20] sm:$0xff]  ;;  %v71_v24 = vld [vmem:[%s562_s0 + $0x28] sm:$0xff] }
   0xc   :  { %v139_v17 = vadd.f32 %v104_v15, %v69_v14  ;;  %v173_v21 = vadd.f32 %v138_v12, %v33_v8  ;;  %v140_v22 = vadd.f32 %v105_v20, %v70_v19  ;;  %v106_v25 = vld [vmem:[%s563_s1 + $0x28] sm:$0xff]  ;;  %v37_v28 = vld [vmem:[#allocation2 + $0x30] sm:$0xff]  ;;  %v38_v33 = vld [vmem:[#allocation2 + $0x38] sm:$0xff] }
   0xd   :  { %206 = vst [vmem:[#allocation5] sm:$0xff] %v171_v11  ;;  %v141_v27 = vadd.f32 %v106_v25, %v71_v24  ;;  %v72_v29 = vld [vmem:[%s562_s0 + $0x30] sm:$0xff]  ;;  %v73_v34 = vld [vmem:[%s562_s0 + $0x38] sm:$0xff]  ;;  %v39_v38 = vld [vmem:[#allocation2 + $0x40] sm:$0xff] }
   0xe   :  { %207 = vst [vmem:[#allocation5 + $0x8] sm:$0xff] %v172_v16  ;;  %v174_v26 = vadd.f32 %v139_v17, %v34_v13  ;;  %v107_v30 = vld [vmem:[%s563_s1 + $0x30] sm:$0xff]  ;;  %v175_v31 = vadd.f32 %v140_v22, %v35_v18  ;;  %v108_v35 = vld [vmem:[%s563_s1 + $0x38] sm:$0xff]  ;;  %v74_v39 = vld [vmem:[%s562_s0 + $0x40] sm:$0xff] }
   0xf   :  { %208 = vst [vmem:[#allocation5 + $0x10] sm:$0xff] %v173_v21  ;;  %v142_v32 = vadd.f32 %v107_v30, %v72_v29  ;;  %v176_v36 = vadd.f32 %v141_v27, %v36_v23  ;;  %v143_v37 = vadd.f32 %v108_v35, %v73_v34  ;;  %v109_v40 = vld [vmem:[%s563_s1 + $0x40] sm:$0xff]  ;;  %v40_v43 = vld [vmem:[#allocation2 + $0x48] sm:$0xff]  ;;  %v41_v48 = vld [vmem:[#allocation2 + $0x50] sm:$0xff] }
  0x10   :  { %209 = vst [vmem:[#allocation5 + $0x18] sm:$0xff] %v174_v26  ;;  %v144_v42 = vadd.f32 %v109_v40, %v74_v39  ;;  %v75_v44 = vld [vmem:[%s562_s0 + $0x48] sm:$0xff]  ;;  %v76_v49 = vld [vmem:[%s562_s0 + $0x50] sm:$0xff]  ;;  %v42_v53 = vld [vmem:[#allocation2 + $0x58] sm:$0xff] }
  0x11   :  { %210 = vst [vmem:[#allocation5 + $0x20] sm:$0xff] %v175_v31  ;;  %v177_v41 = vadd.f32 %v142_v32, %v37_v28  ;;  %v110_v45 = vld [vmem:[%s563_s1 + $0x48] sm:$0xff]  ;;  %v178_v46 = vadd.f32 %v143_v37, %v38_v33  ;;  %v111_v50 = vld [vmem:[%s563_s1 + $0x50] sm:$0xff]  ;;  %v77_v54 = vld [vmem:[%s562_s0 + $0x58] sm:$0xff] }
  0x12   :  { %211 = vst [vmem:[#allocation5 + $0x28] sm:$0xff] %v176_v36  ;;  %v145_v47 = vadd.f32 %v110_v45, %v75_v44  ;;  %v179_v51 = vadd.f32 %v144_v42, %v39_v38  ;;  %v146_v52 = vadd.f32 %v111_v50, %v76_v49  ;;  %v112_v55 = vld [vmem:[%s563_s1 + $0x58] sm:$0xff]  ;;  %v43_v58 = vld [vmem:[#allocation2 + $0x60] sm:$0xff]  ;;  %v44_v63 = vld [vmem:[#allocation2 + $0x68] sm:$0xff] }
  0x13   :  { %212 = vst [vmem:[#allocation5 + $0x30] sm:$0xff] %v177_v41  ;;  %v147_v57 = vadd.f32 %v112_v55, %v77_v54  ;;  %v78_v59 = vld [vmem:[%s562_s0 + $0x60] sm:$0xff]  ;;  %v79_v0 = vld [vmem:[%s562_s0 + $0x68] sm:$0xff]  ;;  %v45_v4 = vld [vmem:[#allocation2 + $0x70] sm:$0xff] }
  0x14   :  { %213 = vst [vmem:[#allocation5 + $0x38] sm:$0xff] %v178_v46  ;;  %v180_v56 = vadd.f32 %v145_v47, %v40_v43  ;;  %v113_v60 = vld [vmem:[%s563_s1 + $0x60] sm:$0xff]  ;;  %v181_v61 = vadd.f32 %v146_v52, %v41_v48  ;;  %v114_v1 = vld [vmem:[%s563_s1 + $0x68] sm:$0xff]  ;;  %v80_v5 = vld [vmem:[%s562_s0 + $0x70] sm:$0xff] }
  0x15   :  { %214 = vst [vmem:[#allocation5 + $0x40] sm:$0xff] %v179_v51  ;;  %v148_v62 = vadd.f32 %v113_v60, %v78_v59  ;;  %v182_v2 = vadd.f32 %v147_v57, %v42_v53  ;;  %v149_v3 = vadd.f32 %v114_v1, %v79_v0  ;;  %v115_v6 = vld [vmem:[%s563_s1 + $0x70] sm:$0xff]  ;;  %v46_v9 = vld [vmem:[#allocation2 + $0x78] sm:$0xff]  ;;  %v47_v14 = vld [vmem:[#allocation2 + $0x80] sm:$0xff] }
  0x16   :  { %215 = vst [vmem:[#allocation5 + $0x48] sm:$0xff] %v180_v56  ;;  %v150_v8 = vadd.f32 %v115_v6, %v80_v5  ;;  %v81_v10 = vld [vmem:[%s562_s0 + $0x78] sm:$0xff]  ;;  %v82_v15 = vld [vmem:[%s562_s0 + $0x80] sm:$0xff]  ;;  %v48_v19 = vld [vmem:[#allocation2 + $0x88] sm:$0xff] }
  0x17   :  { %216 = vst [vmem:[#allocation5 + $0x50] sm:$0xff] %v181_v61  ;;  %v183_v7 = vadd.f32 %v148_v62, %v43_v58  ;;  %v116_v11 = vld [vmem:[%s563_s1 + $0x78] sm:$0xff]  ;;  %v184_v12 = vadd.f32 %v149_v3, %v44_v63  ;;  %v117_v16 = vld [vmem:[%s563_s1 + $0x80] sm:$0xff]  ;;  %v83_v20 = vld [vmem:[%s562_s0 + $0x88] sm:$0xff] }
  0x18   :  { %217 = vst [vmem:[#allocation5 + $0x58] sm:$0xff] %v182_v2  ;;  %v151_v13 = vadd.f32 %v116_v11, %v81_v10  ;;  %v185_v17 = vadd.f32 %v150_v8, %v45_v4  ;;  %v152_v18 = vadd.f32 %v117_v16, %v82_v15  ;;  %v118_v21 = vld [vmem:[%s563_s1 + $0x88] sm:$0xff]  ;;  %v49_v24 = vld [vmem:[#allocation2 + $0x90] sm:$0xff]  ;;  %v50_v29 = vld [vmem:[#allocation2 + $0x98] sm:$0xff] }
  0x19   :  { %218 = vst [vmem:[#allocation5 + $0x60] sm:$0xff] %v183_v7  ;;  %v153_v23 = vadd.f32 %v118_v21, %v83_v20  ;;  %v84_v25 = vld [vmem:[%s562_s0 + $0x90] sm:$0xff]  ;;  %v85_v30 = vld [vmem:[%s562_s0 + $0x98] sm:$0xff]  ;;  %v51_v34 = vld [vmem:[#allocation2 + $0xa0] sm:$0xff] }
  0x1a   :  { %219 = vst [vmem:[#allocation5 + $0x68] sm:$0xff] %v184_v12  ;;  %v186_v22 = vadd.f32 %v151_v13, %v46_v9  ;;  %v119_v26 = vld [vmem:[%s563_s1 + $0x90] sm:$0xff]  ;;  %v187_v27 = vadd.f32 %v152_v18, %v47_v14  ;;  %v120_v31 = vld [vmem:[%s563_s1 + $0x98] sm:$0xff]  ;;  %v86_v35 = vld [vmem:[%s562_s0 + $0xa0] sm:$0xff] }
  0x1b   :  { %220 = vst [vmem:[#allocation5 + $0x70] sm:$0xff] %v185_v17  ;;  %v154_v28 = vadd.f32 %v119_v26, %v84_v25  ;;  %v188_v32 = vadd.f32 %v153_v23, %v48_v19  ;;  %v155_v33 = vadd.f32 %v120_v31, %v85_v30  ;;  %v121_v36 = vld [vmem:[%s563_s1 + $0xa0] sm:$0xff]  ;;  %v52_v39 = vld [vmem:[#allocation2 + $0xa8] sm:$0xff]  ;;  %v53_v44 = vld [vmem:[#allocation2 + $0xb0] sm:$0xff] }
  0x1c   :  { %221 = vst [vmem:[#allocation5 + $0x78] sm:$0xff] %v186_v22  ;;  %v156_v38 = vadd.f32 %v121_v36, %v86_v35  ;;  %v87_v40 = vld [vmem:[%s562_s0 + $0xa8] sm:$0xff]  ;;  %v88_v45 = vld [vmem:[%s562_s0 + $0xb0] sm:$0xff]  ;;  %v54_v49 = vld [vmem:[#allocation2 + $0xb8] sm:$0xff] }
  0x1d   :  { %222 = vst [vmem:[#allocation5 + $0x80] sm:$0xff] %v187_v27  ;;  %v189_v37 = vadd.f32 %v154_v28, %v49_v24  ;;  %v122_v41 = vld [vmem:[%s563_s1 + $0xa8] sm:$0xff]  ;;  %v190_v42 = vadd.f32 %v155_v33, %v50_v29  ;;  %v123_v46 = vld [vmem:[%s563_s1 + $0xb0] sm:$0xff]  ;;  %v89_v50 = vld [vmem:[%s562_s0 + $0xb8] sm:$0xff] }
  0x1e   :  { %223 = vst [vmem:[#allocation5 + $0x88] sm:$0xff] %v188_v32  ;;  %v157_v43 = vadd.f32 %v122_v41, %v87_v40  ;;  %v191_v47 = vadd.f32 %v156_v38, %v51_v34  ;;  %v158_v48 = vadd.f32 %v123_v46, %v88_v45  ;;  %v124_v51 = vld [vmem:[%s563_s1 + $0xb8] sm:$0xff]  ;;  %v55_v54 = vld [vmem:[#allocation2 + $0xc0] sm:$0xff]  ;;  %v56_v59 = vld [vmem:[#allocation2 + $0xc8] sm:$0xff] }
  0x1f   :  { %224 = vst [vmem:[#allocation5 + $0x90] sm:$0xff] %v189_v37  ;;  %v159_v53 = vadd.f32 %v124_v51, %v89_v50  ;;  %v90_v55 = vld [vmem:[%s562_s0 + $0xc0] sm:$0xff]  ;;  %v91_v60 = vld [vmem:[%s562_s0 + $0xc8] sm:$0xff]  ;;  %v57_v0 = vld [vmem:[#allocation2 + $0xd0] sm:$0xff] }
  0x20   :  { %225 = vst [vmem:[#allocation5 + $0x98] sm:$0xff] %v190_v42  ;;  %v192_v52 = vadd.f32 %v157_v43, %v52_v39  ;;  %v125_v56 = vld [vmem:[%s563_s1 + $0xc0] sm:$0xff]  ;;  %v193_v57 = vadd.f32 %v158_v48, %v53_v44  ;;  %v126_v61 = vld [vmem:[%s563_s1 + $0xc8] sm:$0xff]  ;;  %v92_v1 = vld [vmem:[%s562_s0 + $0xd0] sm:$0xff] }
  0x21   :  { %226 = vst [vmem:[#allocation5 + $0xa0] sm:$0xff] %v191_v47  ;;  %v160_v58 = vadd.f32 %v125_v56, %v90_v55  ;;  %v194_v62 = vadd.f32 %v159_v53, %v54_v49  ;;  %v161_v63 = vadd.f32 %v126_v61, %v91_v60  ;;  %v127_v2 = vld [vmem:[%s563_s1 + $0xd0] sm:$0xff]  ;;  %v58_v5 = vld [vmem:[#allocation2 + $0xd8] sm:$0xff]  ;;  %v59_v10 = vld [vmem:[#allocation2 + $0xe0] sm:$0x7] }
  0x22   :  { %227 = vst [vmem:[#allocation5 + $0xa8] sm:$0xff] %v192_v52  ;;  %v162_v4 = vadd.f32 %v127_v2, %v92_v1  ;;  %v93_v6 = vld [vmem:[%s562_s0 + $0xd8] sm:$0xff]  ;;  %v94_v11 = vld [vmem:[%s562_s0 + $0xe0] sm:$0x7]  ;;  %v60_v14 = vld [vmem:[#allocation2 + $0xe8] sm:$0x7] }
  0x23   :  { %228 = vst [vmem:[#allocation5 + $0xb0] sm:$0xff] %v193_v57  ;;  %v195_v3 = vadd.f32 %v160_v58, %v55_v54  ;;  %v128_v7 = vld [vmem:[%s563_s1 + $0xd8] sm:$0xff]  ;;  %v196_v8 = vadd.f32 %v161_v63, %v56_v59  ;;  %v129_v13 = vld [vmem:[%s563_s1 + $0xe0] sm:$0x7]  ;;  %v95_v17 = vld [vmem:[%s562_s0 + $0xe8] sm:$0x7] }
  0x24   :  { %229 = vst [vmem:[#allocation5 + $0xb8] sm:$0xff] %v194_v62  ;;  %v163_v9 = vadd.f32 %v128_v7, %v93_v6  ;;  %v197_v12 = vadd.f32 %v162_v4, %v57_v0  ;;  %v164_v16 = vadd.f32 %v129_v13, %v94_v11  ;;  %v130_v18 = vld [vmem:[%s563_s1 + $0xe8] sm:$0x7]  ;;  %v61_v20 = vld [vmem:[#allocation2 + $0xf0] sm:$0x7] }
  0x25   :  { %230 = vst [vmem:[#allocation5 + $0xc0] sm:$0xff] %v195_v3  ;;  %v165_v19 = vadd.f32 %v130_v18, %v95_v17  ;;  %v96_v21 = vld [vmem:[%s562_s0 + $0xf0] sm:$0x7]  ;;  %v62_v24 = vld [vmem:[#allocation2 + $0xf8] sm:$0x7] }
  0x26   :  { %231 = vst [vmem:[#allocation5 + $0xc8] sm:$0xff] %v196_v8  ;;  %v198_v15 = vadd.f32 %v163_v9, %v58_v5  ;;  %v199_v22 = vadd.f32 %v164_v16, %v59_v10  ;;  %v131_v23 = vld [vmem:[%s563_s1 + $0xf0] sm:$0x7]  ;;  %v97_v27 = vld [vmem:[%s562_s0 + $0xf8] sm:$0x7] }
  0x27   :  { %232 = vst [vmem:[#allocation5 + $0xd0] sm:$0xff] %v197_v12  ;;  %v200_v25 = vadd.f32 %v165_v19, %v60_v14  ;;  %v166_v26 = vadd.f32 %v131_v23, %v96_v21  ;;  %v132_v28 = vld [vmem:[%s563_s1 + $0xf8] sm:$0x7]  ;;  %v63_v29 = vld [vmem:[#allocation2 + $0x100] sm:$0x7] }
  0x28   :  { %233 = vst [vmem:[#allocation5 + $0xd8] sm:$0xff] %v198_v15  ;;  %v167_v30 = vadd.f32 %v132_v28, %v97_v27  ;;  %v98_v31 = vld [vmem:[%s562_s0 + $0x100] sm:$0x7]  ;;  %v99_v35 = vld [vmem:[%s562_s0 + $0x108] sm:$0x7] }
  0x29   :  { %234 = vst [vmem:[#allocation5 + $0xe0] sm:$0x7] %v199_v22  ;;  %v133_v32 = vld [vmem:[%s563_s1 + $0x100] sm:$0x7]  ;;  %v201_v33 = vadd.f32 %v166_v26, %v61_v20  ;;  %v64_v37 = vld [vmem:[#allocation2 + $0x108] sm:$0x7] }
  0x2a   :  { %235 = vst [vmem:[#allocation5 + $0xe8] sm:$0x7] %v200_v25  ;;  %v168_v34 = vadd.f32 %v133_v32, %v98_v31  ;;  %v202_v36 = vadd.f32 %v167_v30, %v62_v24  ;;  %v134_v38 = vld [vmem:[%s563_s1 + $0x108] sm:$0x7]  ;;  %v100_v39 = vld [vmem:[%s562_s0 + $0x110] sm:$0x7] }
  0x2b   :  { %236 = vst [vmem:[#allocation5 + $0xf0] sm:$0x7] %v201_v33  ;;  %v169_v41 = vadd.f32 %v134_v38, %v99_v35  ;;  %v65_v42 = vld [vmem:[#allocation2 + $0x110] sm:$0x7] }
  0x2c   :  { %v203_v40 = vadd.f32 %v168_v34, %v63_v29  ;;  %v135_v43 = vld [vmem:[%s563_s1 + $0x110] sm:$0x7]  ;;  %237 = vst [vmem:[#allocation5 + $0xf8] sm:$0x7] %v202_v36 }
  0x2d   :  { %v170_v44 = vadd.f32 %v135_v43, %v100_v39  ;;  %v204_v45 = vadd.f32 %v169_v41, %v64_v37 }
  0x2e   :  { %238 = vst [vmem:[#allocation5 + $0x100] sm:$0x7] %v203_v40 }
  0x2f   :  { %v205_v46 = vadd.f32 %v170_v44, %v65_v42  ;;  %239 = vst [vmem:[#allocation5 + $0x108] sm:$0x7] %v204_v45 }
  0x31   :  { %240 = vst [vmem:[#allocation5 + $0x110] sm:$0x7] %v205_v46 }
  0x32   :  { %253 = dma.vmem_to_hbm [thread:$0]  %s246_s23, 4480, %s248_s26, [#allocation4], %s317_s17, %s317_s17, %s318_s18  }
  0x33   :  { %314 = dma.done.wait [#allocation4], 4480  }
  0x34   :  { %315 = vsyncadd [#allocation4], 4294962816 }
  0x35   :  { %258 = vsyncpa [#allocation3], 1 }
  0x36   :  { %259 = vsyncpa [#allocation4], 1 }

</bundles_post_ra>
